<compile_context>
chip_gen: v7x
topology: tpu7x:2x2x1
jax: 0.10.0
libtpu: 0.0.40
codegen_flags: <defaults>
</compile_context>

<pallas_src>
import functools

import jax
import jax.numpy as jnp
from jax.experimental import pallas as pl
from jax.experimental.pallas import tpu as pltpu

OUT_PAD = 8  # pad the 3 output channels to 8 so every sublane slab is aligned


def _round_up(x, m):
    return (x + m - 1) // m * m


def _choose_tile_p(P, target=2048):
    """Largest multiple of 128 dividing P that is <= target; else the full axis.

    target=2048 -> 8 grid steps at the production P=16384 (>=4 per v7x core)
    and a comfortable vreg working set; a full-axis block is always legal and
    maximally lane-dense for small P."""
    best = None
    tp = 128
    while tp <= min(P, target):
        if P % tp == 0:
            best = tp
        tp += 128
    return best if best is not None else P


def _param_offsets(input_dim, hidden_dims):
    """Row offsets of each layer inside the concatenated (n_rows, P) array."""
    h0, h1, h2 = hidden_dims
    offs = {}
    r = 0
    offs["w1"] = r; r += input_dim * h0
    offs["b1"] = r; r += h0
    offs["w2"] = r; r += h0 * h1
    offs["b2"] = r; r += h1
    offs["w3"] = r; r += h1 * h2
    offs["b3"] = r; r += h2
    offs["wo"] = r; r += h2 * OUT_PAD
    offs["bo"] = r; r += OUT_PAD
    return offs, r


def _make_kernel(B, input_dim, hidden_dims):
    h0, h1, h2 = hidden_dims
    offs, n_rows = _param_offsets(input_dim, hidden_dims)

    def kernel(light_ref, params_ref, o_ref, pf32_ref):
        # light_ref : (B, D) f32 in SMEM (scalar reads)
        # params_ref: (n_rows, TP) bf16 in VMEM (streamed per grid step)
        # o_ref     : (B, 3, TP) f32
        # pf32_ref  : (n_rows, TP) f32 VMEM scratch
        #
        # Hoisted bf16 -> f32 upcast: one vectorized cast per grid step; every
        # read below is an 8-row-aligned f32 VMEM load.
        pf32_ref[...] = params_ref[...].astype(jnp.float32)

        def slab(base, k, rows):
            start = base + k * rows
            return pf32_ref[start:start + rows, :]            # (rows, TP) f32

        def layer(h_row_fn, w_off, b_off, out_dim, in_dim, relu):
            # Sublane-dense accumulator: (out_dim, TP), out_dim == 8.
            acc = pf32_ref[b_off:b_off + out_dim, :]
            for k in range(in_dim):
                acc = acc + h_row_fn(k) * slab(w_off, k, out_dim)
            if relu:
                acc = jnp.maximum(acc, 0.0)
            return acc

        for b in range(B):
            # Layer 1: the light direction is a per-batch SMEM scalar.
            h = layer(lambda k, b=b: light_ref[b, k],
                      offs["w1"], offs["b1"], h0, input_dim, True)
            h = layer(lambda k, h=h: h[k:k + 1, :],
                      offs["w2"], offs["b2"], h1, h0, True)
            h = layer(lambda k, h=h: h[k:k + 1, :],
                      offs["w3"], offs["b3"], h2, h1, True)
            o = layer(lambda k, h=h: h[k:k + 1, :],
                      offs["wo"], offs["bo"], OUT_PAD, h2, False)
            # Only the first 3 (real) channels are stored; direct per-batch
            # write, no stack/relayout.
            o_ref[b, :, :] = jax.nn.sigmoid(o[:3, :])

    return kernel, n_rows


def true_pixelwise_mlp_relight(light, params_rows, *, input_dim, hidden_dims,
                               patch_size, num_patches_h, num_patches_w,
                               tile_p_target=2048):
    """light: (B, D) f32.  params_rows: (n_rows, P) bf16 from to_kernel_layout."""
    B, D = light.shape
    assert D == input_dim
    P = num_patches_h * num_patches_w
    tile_p = _choose_tile_p(P, tile_p_target)
    assert P % tile_p == 0

    kernel, n_rows = _make_kernel(B, input_dim, tuple(hidden_dims))
    assert params_rows.shape == (n_rows, P), (params_rows.shape, n_rows, P)

    # VMEM budget: double-buffered bf16 param tile (16-row sublane padding) +
    # f32 upcast scratch + double-buffered f32 output tile (3 -> 8 row pad),
    # plus headroom; clamped below v7x's 64 MiB physical VMEM.
    bf16_tile = _round_up(n_rows, 16) * tile_p * 2
    f32_scratch = _round_up(n_rows, 8) * tile_p * 4
    out_tile = B * 8 * tile_p * 4
    vmem_limit = 2 * bf16_tile + f32_scratch + 2 * out_tile + (12 << 20)
    vmem_limit = int(min(max(vmem_limit, 16 << 20), 48 << 20))

    patch_rgb_flat = pl.pallas_call(
        kernel,
        out_shape=jax.ShapeDtypeStruct((B, 3, P), jnp.float32),
        grid_spec=pltpu.PrefetchScalarGridSpec(
            num_scalar_prefetch=0,
            grid=(P // tile_p,),
            in_specs=[
                pl.BlockSpec(memory_space=pltpu.MemorySpace.SMEM),  # light
                pl.BlockSpec((n_rows, tile_p), lambda p: (0, p)),   # params
            ],
            out_specs=pl.BlockSpec((B, 3, tile_p), lambda p: (0, 0, p)),
            scratch_shapes=[pltpu.VMEM((n_rows, tile_p), jnp.float32)],
        ),
        compiler_params=pltpu.CompilerParams(
            dimension_semantics=("parallel",),
            vmem_limit_bytes=vmem_limit),
    )(light, params_rows)

    # Nearest-neighbour patch -> pixel upsample in plain JAX: one
    # broadcast+reshape copy is the only op touching the full image.
    # TODO(synk): emit the image in bf16 if downstream allows (halves the
    # dominant HBM write at production 1024x1024).
    patch_rgb = patch_rgb_flat.reshape(B, 3, num_patches_h, num_patches_w)
    patch_rgb = jnp.transpose(patch_rgb, (0, 2, 3, 1))  # (B, Ph, Pw, 3)
    img = jnp.broadcast_to(
        patch_rgb[:, :, None, :, None, :],
        (B, num_patches_h, patch_size, num_patches_w, patch_size, 3))
    return img.reshape(B, num_patches_h * patch_size,
                       num_patches_w * patch_size, 3)


def init_torch_layout_params(key, num_patches_h, num_patches_w,
                             input_dim, hidden_dims):
    """Deterministic params in the PyTorch parameter layout (f32)."""
    ks = jax.random.split(key, 4)
    Ph, Pw = num_patches_h, num_patches_w
    h0, h1, h2 = hidden_dims
    w1 = jax.random.normal(ks[0], (Ph, Pw, h0, input_dim), jnp.float32) * 0.01
    b1 = jnp.zeros((Ph, Pw, h0), jnp.float32)
    w2 = jax.random.normal(ks[1], (Ph, Pw, h1, h0), jnp.float32) * 0.01
    b2 = jnp.zeros((Ph, Pw, h1), jnp.float32)
    w3 = jax.random.normal(ks[2], (Ph, Pw, h2, h1), jnp.float32) * 0.01
    b3 = jnp.zeros((Ph, Pw, h2), jnp.float32)
    wo = jax.random.normal(ks[3], (Ph, Pw, 3, h2), jnp.float32) * 0.01
    bo = jnp.zeros((Ph, Pw, 3), jnp.float32)
    return (w1, b1, w2, b2, w3, b3, wo, bo)


def to_kernel_layout(pt_params, dtype=jnp.bfloat16):
    """Pack all layers into ONE (n_rows, P) array (bf16 by default).

    Weights [Ph,Pw,out,in] -> rows indexed k*out + o (k = input index) so the
    per-k slab of `out` rows is contiguous and 8-aligned; biases [Ph,Pw,out]
    -> (out, P).  The 3-channel output layer is zero-padded to OUT_PAD=8.
    """
    w1, b1, w2, b2, w3, b3, wo, bo = pt_params

    def wrows(w):                                   # (Ph,Pw,o,i) -> (i*o, P)
        Ph, Pw, o, i = w.shape
        return jnp.transpose(w.reshape(Ph * Pw, o, i), (2, 1, 0)).reshape(i * o, Ph * Pw)

    def brows(b):                                   # (Ph,Pw,o) -> (o, P)
        Ph, Pw, o = b.shape
        return b.reshape(Ph * Pw, o).T

    Ph, Pw, _, h_last = wo.shape
    wo_p = jnp.zeros((Ph, Pw, OUT_PAD, h_last), wo.dtype).at[:, :, :3, :].set(wo)
    bo_p = jnp.zeros((Ph, Pw, OUT_PAD), bo.dtype).at[:, :, :3].set(bo)

    rows = [wrows(w1), brows(b1), wrows(w2), brows(b2),
            wrows(w3), brows(b3), wrows(wo_p), brows(bo_p)]
    return jnp.concatenate(rows, axis=0).astype(dtype)


def reference_forward(light, pt_params, patch_size, Ph, Pw):
    """Pure-JAX transcription of the PyTorch forward (f32, for verification)."""
    w1, b1, w2, b2, w3, b3, wo, bo = pt_params
    B, D = light.shape
    x = jnp.broadcast_to(light[:, None, None, :], (B, Ph, Pw, D))
    h = jnp.sum(x[..., None, :] * w1[None], axis=-1) + b1[None]
    h = jnp.maximum(h, 0.0)
    h = jnp.sum(h[..., None, :] * w2[None], axis=-1) + b2[None]
    h = jnp.maximum(h, 0.0)
    h = jnp.sum(h[..., None, :] * w3[None], axis=-1) + b3[None]
    h = jnp.maximum(h, 0.0)
    o = jnp.sum(h[..., None, :] * wo[None], axis=-1) + bo[None]
    o = jax.nn.sigmoid(o)
    o = jnp.broadcast_to(o[:, :, None, :, None, :],
                         (B, Ph, patch_size, Pw, patch_size, 3))
    return o.reshape(B, Ph * patch_size, Pw * patch_size, 3)


if __name__ == "__main__":
    # Small shapes consistent with the module: image 128x128 (patch_size=8 ->
    # 16x16 = 256 patches), batch=2, input_dim=2, hidden_dims=[8,8,8].  At the
    # production P=16384 the same code picks tile_p=2048 -> 8 grid steps.
    IMG = 128
    PATCH = 8
    PH = PW = IMG // PATCH          # 16 x 16 = 256 patches
    B, D = 2, 2
    HIDDEN = [8, 8, 8]

    key = jax.random.PRNGKey(0)
    k_light, k_params = jax.random.split(key)

    light = jax.random.normal(k_light, (B, D), jnp.float32)
    pt_params = init_torch_layout_params(k_params, PH, PW, D, HIDDEN)
    kparams = to_kernel_layout(pt_params)   # single (240, P) bf16 array

    run = jax.jit(functools.partial(
        true_pixelwise_mlp_relight, input_dim=D, hidden_dims=HIDDEN,
        patch_size=PATCH, num_patches_h=PH, num_patches_w=PW,
        tile_p_target=2048))

    out = run(light, kparams)
    out = jax.block_until_ready(out)

    ref = reference_forward(light, pt_params, PATCH, PH, PW)
    assert out.shape == (B, IMG, IMG, 3), out.shape
    # bf16 weight streaming: loosen tolerance slightly (observed error ~1e-4).
    assert jnp.allclose(out, ref, rtol=1e-2, atol=2e-3), (
        float(jnp.max(jnp.abs(out - ref))))

    print("KERNEL_OK")
</pallas_src>

<mosaic_0001>
module attributes {stable_mosaic.version = 11 : i64} {
  func.func @kernel(%arg0: i32, %arg1: memref<2x2xf32, #tpu.memory_space<smem>>, %arg2: memref<240x256xbf16, #tpu.memory_space<vmem>>, %arg3: memref<2x3x256xf32, #tpu.memory_space<vmem>>, %arg4: memref<240x256xf32, #tpu.memory_space<vmem>>) attributes {dimension_semantics = [#tpu.dimension_semantics<parallel>], iteration_bounds = array<i64: 1>, scalar_prefetch = 0 : i64, scratch_operands = 1 : i64, tpu.core_type = #tpu.core_type<tc>, window_params = [{transform_indices = @transform_0, window_bounds = array<i64: 2, 2>}, {transform_indices = @transform_1, window_bounds = array<i64: 240, 256>}, {transform_indices = @transform_2, window_bounds = array<i64: 2, 3, 256>}]} {
    %c0 = arith.constant 0 : index
    %c0_0 = arith.constant 0 : index
    %0 = vector.load %arg2[%c0, %c0_0] : memref<240x256xbf16, #tpu.memory_space<vmem>>, vector<240x256xbf16>
    %1 = arith.extf %0 : vector<240x256xbf16> to vector<240x256xf32>
    %c0_1 = arith.constant 0 : index
    %c0_2 = arith.constant 0 : index
    %2 = vector.load %arg4[%c0_1, %c0_2] : memref<240x256xf32, #tpu.memory_space<vmem>>, vector<240x256xf32>
    tpu.vector_store %arg4[%c0_1, %c0_2], %1 {strides = array<i32>} : memref<240x256xf32, #tpu.memory_space<vmem>>, vector<240x256xf32>,
    %c16 = arith.constant 16 : index
    %c0_3 = arith.constant 0 : index
    %3 = vector.load %arg4[%c16, %c0_3] : memref<240x256xf32, #tpu.memory_space<vmem>>, vector<8x256xf32>
    %c0_4 = arith.constant 0 : index
    %c0_5 = arith.constant 0 : index
    %4 = memref.load %arg1[%c0_4, %c0_5] : memref<2x2xf32, #tpu.memory_space<smem>>
    %c0_6 = arith.constant 0 : index
    %c0_7 = arith.constant 0 : index
    %5 = vector.load %arg4[%c0_6, %c0_7] : memref<240x256xf32, #tpu.memory_space<vmem>>, vector<8x256xf32>
    %6 = vector.broadcast %4 : f32 to vector<8x256xf32>
    %7 = arith.mulf %6, %5 : vector<8x256xf32>
    %8 = arith.addf %3, %7 : vector<8x256xf32>
    %c0_8 = arith.constant 0 : index
    %c1 = arith.constant 1 : index
    %9 = memref.load %arg1[%c0_8, %c1] : memref<2x2xf32, #tpu.memory_space<smem>>
    %c8 = arith.constant 8 : index
    %c0_9 = arith.constant 0 : index
    %10 = vector.load %arg4[%c8, %c0_9] : memref<240x256xf32, #tpu.memory_space<vmem>>, vector<8x256xf32>
    %11 = vector.broadcast %9 : f32 to vector<8x256xf32>
    %12 = arith.mulf %11, %10 : vector<8x256xf32>
    %13 = arith.addf %8, %12 : vector<8x256xf32>
    %cst = arith.constant 0.000000e+00 : f32
    %14 = vector.broadcast %cst : f32 to vector<8x256xf32>
    %15 = arith.maximumf %13, %14 : vector<8x256xf32>
    %c88 = arith.constant 88 : index
    %c0_10 = arith.constant 0 : index
    %16 = vector.load %arg4[%c88, %c0_10] : memref<240x256xf32, #tpu.memory_space<vmem>>, vector<8x256xf32>
    %17 = vector.extract_strided_slice %15 {offsets = [0, 0], sizes = [1, 256], strides = [1, 1]} : vector<8x256xf32> to vector<1x256xf32>
    %c24 = arith.constant 24 : index
    %c0_11 = arith.constant 0 : index
    %18 = vector.load %arg4[%c24, %c0_11] : memref<240x256xf32, #tpu.memory_space<vmem>>, vector<8x256xf32>
    %19 = vector.broadcast %17 : vector<1x256xf32> to vector<8x256xf32>
    %20 = arith.mulf %19, %18 : vector<8x256xf32>
    %21 = arith.addf %16, %20 : vector<8x256xf32>
    %22 = vector.extract_strided_slice %15 {offsets = [1, 0], sizes = [1, 256], strides = [1, 1]} : vector<8x256xf32> to vector<1x256xf32>
    %c32 = arith.constant 32 : index
    %c0_12 = arith.constant 0 : index
    %23 = vector.load %arg4[%c32, %c0_12] : memref<240x256xf32, #tpu.memory_space<vmem>>, vector<8x256xf32>
    %24 = vector.broadcast %22 : vector<1x256xf32> to vector<8x256xf32>
    %25 = arith.mulf %24, %23 : vector<8x256xf32>
    %26 = arith.addf %21, %25 : vector<8x256xf32>
    %27 = vector.extract_strided_slice %15 {offsets = [2, 0], sizes = [1, 256], strides = [1, 1]} : vector<8x256xf32> to vector<1x256xf32>
    %c40 = arith.constant 40 : index
    %c0_13 = arith.constant 0 : index
    %28 = vector.load %arg4[%c40, %c0_13] : memref<240x256xf32, #tpu.memory_space<vmem>>, vector<8x256xf32>
    %29 = vector.broadcast %27 : vector<1x256xf32> to vector<8x256xf32>
    %30 = arith.mulf %29, %28 : vector<8x256xf32>
    %31 = arith.addf %26, %30 : vector<8x256xf32>
    %32 = vector.extract_strided_slice %15 {offsets = [3, 0], sizes = [1, 256], strides = [1, 1]} : vector<8x256xf32> to vector<1x256xf32>
    %c48 = arith.constant 48 : index
    %c0_14 = arith.constant 0 : index
    %33 = vector.load %arg4[%c48, %c0_14] : memref<240x256xf32, #tpu.memory_space<vmem>>, vector<8x256xf32>
    %34 = vector.broadcast %32 : vector<1x256xf32> to vector<8x256xf32>
    %35 = arith.mulf %34, %33 : vector<8x256xf32>
    %36 = arith.addf %31, %35 : vector<8x256xf32>
    %37 = vector.extract_strided_slice %15 {offsets = [4, 0], sizes = [1, 256], strides = [1, 1]} : vector<8x256xf32> to vector<1x256xf32>
    %c56 = arith.constant 56 : index
    %c0_15 = arith.constant 0 : index
    %38 = vector.load %arg4[%c56, %c0_15] : memref<240x256xf32, #tpu.memory_space<vmem>>, vector<8x256xf32>
    %39 = vector.broadcast %37 : vector<1x256xf32> to vector<8x256xf32>
    %40 = arith.mulf %39, %38 : vector<8x256xf32>
    %41 = arith.addf %36, %40 : vector<8x256xf32>
    %42 = vector.extract_strided_slice %15 {offsets = [5, 0], sizes = [1, 256], strides = [1, 1]} : vector<8x256xf32> to vector<1x256xf32>
    %c64 = arith.constant 64 : index
    %c0_16 = arith.constant 0 : index
    %43 = vector.load %arg4[%c64, %c0_16] : memref<240x256xf32, #tpu.memory_space<vmem>>, vector<8x256xf32>
    %44 = vector.broadcast %42 : vector<1x256xf32> to vector<8x256xf32>
    %45 = arith.mulf %44, %43 : vector<8x256xf32>
    %46 = arith.addf %41, %45 : vector<8x256xf32>
    %47 = vector.extract_strided_slice %15 {offsets = [6, 0], sizes = [1, 256], strides = [1, 1]} : vector<8x256xf32> to vector<1x256xf32>
    %c72 = arith.constant 72 : index
    %c0_17 = arith.constant 0 : index
    %48 = vector.load %arg4[%c72, %c0_17] : memref<240x256xf32, #tpu.memory_space<vmem>>, vector<8x256xf32>
    %49 = vector.broadcast %47 : vector<1x256xf32> to vector<8x256xf32>
    %50 = arith.mulf %49, %48 : vector<8x256xf32>
    %51 = arith.addf %46, %50 : vector<8x256xf32>
    %52 = vector.extract_strided_slice %15 {offsets = [7, 0], sizes = [1, 256], strides = [1, 1]} : vector<8x256xf32> to vector<1x256xf32>
    %c80 = arith.constant 80 : index
    %c0_18 = arith.constant 0 : index
    %53 = vector.load %arg4[%c80, %c0_18] : memref<240x256xf32, #tpu.memory_space<vmem>>, vector<8x256xf32>
    %54 = vector.broadcast %52 : vector<1x256xf32> to vector<8x256xf32>
    %55 = arith.mulf %54, %53 : vector<8x256xf32>
    %56 = arith.addf %51, %55 : vector<8x256xf32>
    %cst_19 = arith.constant 0.000000e+00 : f32
    %57 = vector.broadcast %cst_19 : f32 to vector<8x256xf32>
    %58 = arith.maximumf %56, %57 : vector<8x256xf32>
    %c160 = arith.constant 160 : index
    %c0_20 = arith.constant 0 : index
    %59 = vector.load %arg4[%c160, %c0_20] : memref<240x256xf32, #tpu.memory_space<vmem>>, vector<8x256xf32>
    %60 = vector.extract_strided_slice %58 {offsets = [0, 0], sizes = [1, 256], strides = [1, 1]} : vector<8x256xf32> to vector<1x256xf32>
    %c96 = arith.constant 96 : index
    %c0_21 = arith.constant 0 : index
    %61 = vector.load %arg4[%c96, %c0_21] : memref<240x256xf32, #tpu.memory_space<vmem>>, vector<8x256xf32>
    %62 = vector.broadcast %60 : vector<1x256xf32> to vector<8x256xf32>
    %63 = arith.mulf %62, %61 : vector<8x256xf32>
    %64 = arith.addf %59, %63 : vector<8x256xf32>
    %65 = vector.extract_strided_slice %58 {offsets = [1, 0], sizes = [1, 256], strides = [1, 1]} : vector<8x256xf32> to vector<1x256xf32>
    %c104 = arith.constant 104 : index
    %c0_22 = arith.constant 0 : index
    %66 = vector.load %arg4[%c104, %c0_22] : memref<240x256xf32, #tpu.memory_space<vmem>>, vector<8x256xf32>
    %67 = vector.broadcast %65 : vector<1x256xf32> to vector<8x256xf32>
    %68 = arith.mulf %67, %66 : vector<8x256xf32>
    %69 = arith.addf %64, %68 : vector<8x256xf32>
    %70 = vector.extract_strided_slice %58 {offsets = [2, 0], sizes = [1, 256], strides = [1, 1]} : vector<8x256xf32> to vector<1x256xf32>
    %c112 = arith.constant 112 : index
    %c0_23 = arith.constant 0 : index
    %71 = vector.load %arg4[%c112, %c0_23] : memref<240x256xf32, #tpu.memory_space<vmem>>, vector<8x256xf32>
    %72 = vector.broadcast %70 : vector<1x256xf32> to vector<8x256xf32>
    %73 = arith.mulf %72, %71 : vector<8x256xf32>
    %74 = arith.addf %69, %73 : vector<8x256xf32>
    %75 = vector.extract_strided_slice %58 {offsets = [3, 0], sizes = [1, 256], strides = [1, 1]} : vector<8x256xf32> to vector<1x256xf32>
    %c120 = arith.constant 120 : index
    %c0_24 = arith.constant 0 : index
    %76 = vector.load %arg4[%c120, %c0_24] : memref<240x256xf32, #tpu.memory_space<vmem>>, vector<8x256xf32>
    %77 = vector.broadcast %75 : vector<1x256xf32> to vector<8x256xf32>
    %78 = arith.mulf %77, %76 : vector<8x256xf32>
    %79 = arith.addf %74, %78 : vector<8x256xf32>
    %80 = vector.extract_strided_slice %58 {offsets = [4, 0], sizes = [1, 256], strides = [1, 1]} : vector<8x256xf32> to vector<1x256xf32>
    %c128 = arith.constant 128 : index
    %c0_25 = arith.constant 0 : index
    %81 = vector.load %arg4[%c128, %c0_25] : memref<240x256xf32, #tpu.memory_space<vmem>>, vector<8x256xf32>
    %82 = vector.broadcast %80 : vector<1x256xf32> to vector<8x256xf32>
    %83 = arith.mulf %82, %81 : vector<8x256xf32>
    %84 = arith.addf %79, %83 : vector<8x256xf32>
    %85 = vector.extract_strided_slice %58 {offsets = [5, 0], sizes = [1, 256], strides = [1, 1]} : vector<8x256xf32> to vector<1x256xf32>
    %c136 = arith.constant 136 : index
    %c0_26 = arith.constant 0 : index
    %86 = vector.load %arg4[%c136, %c0_26] : memref<240x256xf32, #tpu.memory_space<vmem>>, vector<8x256xf32>
    %87 = vector.broadcast %85 : vector<1x256xf32> to vector<8x256xf32>
    %88 = arith.mulf %87, %86 : vector<8x256xf32>
    %89 = arith.addf %84, %88 : vector<8x256xf32>
    %90 = vector.extract_strided_slice %58 {offsets = [6, 0], sizes = [1, 256], strides = [1, 1]} : vector<8x256xf32> to vector<1x256xf32>
    %c144 = arith.constant 144 : index
    %c0_27 = arith.constant 0 : index
    %91 = vector.load %arg4[%c144, %c0_27] : memref<240x256xf32, #tpu.memory_space<vmem>>, vector<8x256xf32>
    %92 = vector.broadcast %90 : vector<1x256xf32> to vector<8x256xf32>
    %93 = arith.mulf %92, %91 : vector<8x256xf32>
    %94 = arith.addf %89, %93 : vector<8x256xf32>
    %95 = vector.extract_strided_slice %58 {offsets = [7, 0], sizes = [1, 256], strides = [1, 1]} : vector<8x256xf32> to vector<1x256xf32>
    %c152 = arith.constant 152 : index
    %c0_28 = arith.constant 0 : index
    %96 = vector.load %arg4[%c152, %c0_28] : memref<240x256xf32, #tpu.memory_space<vmem>>, vector<8x256xf32>
    %97 = vector.broadcast %95 : vector<1x256xf32> to vector<8x256xf32>
    %98 = arith.mulf %97, %96 : vector<8x256xf32>
    %99 = arith.addf %94, %98 : vector<8x256xf32>
    %cst_29 = arith.constant 0.000000e+00 : f32
    %100 = vector.broadcast %cst_29 : f32 to vector<8x256xf32>
    %101 = arith.maximumf %99, %100 : vector<8x256xf32>
    %c232 = arith.constant 232 : index
    %c0_30 = arith.constant 0 : index
    %102 = vector.load %arg4[%c232, %c0_30] : memref<240x256xf32, #tpu.memory_space<vmem>>, vector<8x256xf32>
    %103 = vector.extract_strided_slice %101 {offsets = [0, 0], sizes = [1, 256], strides = [1, 1]} : vector<8x256xf32> to vector<1x256xf32>
    %c168 = arith.constant 168 : index
    %c0_31 = arith.constant 0 : index
    %104 = vector.load %arg4[%c168, %c0_31] : memref<240x256xf32, #tpu.memory_space<vmem>>, vector<8x256xf32>
    %105 = vector.broadcast %103 : vector<1x256xf32> to vector<8x256xf32>
    %106 = arith.mulf %105, %104 : vector<8x256xf32>
    %107 = arith.addf %102, %106 : vector<8x256xf32>
    %108 = vector.extract_strided_slice %101 {offsets = [1, 0], sizes = [1, 256], strides = [1, 1]} : vector<8x256xf32> to vector<1x256xf32>
    %c176 = arith.constant 176 : index
    %c0_32 = arith.constant 0 : index
    %109 = vector.load %arg4[%c176, %c0_32] : memref<240x256xf32, #tpu.memory_space<vmem>>, vector<8x256xf32>
    %110 = vector.broadcast %108 : vector<1x256xf32> to vector<8x256xf32>
    %111 = arith.mulf %110, %109 : vector<8x256xf32>
    %112 = arith.addf %107, %111 : vector<8x256xf32>
    %113 = vector.extract_strided_slice %101 {offsets = [2, 0], sizes = [1, 256], strides = [1, 1]} : vector<8x256xf32> to vector<1x256xf32>
    %c184 = arith.constant 184 : index
    %c0_33 = arith.constant 0 : index
    %114 = vector.load %arg4[%c184, %c0_33] : memref<240x256xf32, #tpu.memory_space<vmem>>, vector<8x256xf32>
    %115 = vector.broadcast %113 : vector<1x256xf32> to vector<8x256xf32>
    %116 = arith.mulf %115, %114 : vector<8x256xf32>
    %117 = arith.addf %112, %116 : vector<8x256xf32>
    %118 = vector.extract_strided_slice %101 {offsets = [3, 0], sizes = [1, 256], strides = [1, 1]} : vector<8x256xf32> to vector<1x256xf32>
    %c192 = arith.constant 192 : index
    %c0_34 = arith.constant 0 : index
    %119 = vector.load %arg4[%c192, %c0_34] : memref<240x256xf32, #tpu.memory_space<vmem>>, vector<8x256xf32>
    %120 = vector.broadcast %118 : vector<1x256xf32> to vector<8x256xf32>
    %121 = arith.mulf %120, %119 : vector<8x256xf32>
    %122 = arith.addf %117, %121 : vector<8x256xf32>
    %123 = vector.extract_strided_slice %101 {offsets = [4, 0], sizes = [1, 256], strides = [1, 1]} : vector<8x256xf32> to vector<1x256xf32>
    %c200 = arith.constant 200 : index
    %c0_35 = arith.constant 0 : index
    %124 = vector.load %arg4[%c200, %c0_35] : memref<240x256xf32, #tpu.memory_space<vmem>>, vector<8x256xf32>
    %125 = vector.broadcast %123 : vector<1x256xf32> to vector<8x256xf32>
    %126 = arith.mulf %125, %124 : vector<8x256xf32>
    %127 = arith.addf %122, %126 : vector<8x256xf32>
    %128 = vector.extract_strided_slice %101 {offsets = [5, 0], sizes = [1, 256], strides = [1, 1]} : vector<8x256xf32> to vector<1x256xf32>
    %c208 = arith.constant 208 : index
    %c0_36 = arith.constant 0 : index
    %129 = vector.load %arg4[%c208, %c0_36] : memref<240x256xf32, #tpu.memory_space<vmem>>, vector<8x256xf32>
    %130 = vector.broadcast %128 : vector<1x256xf32> to vector<8x256xf32>
    %131 = arith.mulf %130, %129 : vector<8x256xf32>
    %132 = arith.addf %127, %131 : vector<8x256xf32>
    %133 = vector.extract_strided_slice %101 {offsets = [6, 0], sizes = [1, 256], strides = [1, 1]} : vector<8x256xf32> to vector<1x256xf32>
    %c216 = arith.constant 216 : index
    %c0_37 = arith.constant 0 : index
    %134 = vector.load %arg4[%c216, %c0_37] : memref<240x256xf32, #tpu.memory_space<vmem>>, vector<8x256xf32>
    %135 = vector.broadcast %133 : vector<1x256xf32> to vector<8x256xf32>
    %136 = arith.mulf %135, %134 : vector<8x256xf32>
    %137 = arith.addf %132, %136 : vector<8x256xf32>
    %138 = vector.extract_strided_slice %101 {offsets = [7, 0], sizes = [1, 256], strides = [1, 1]} : vector<8x256xf32> to vector<1x256xf32>
    %c224 = arith.constant 224 : index
    %c0_38 = arith.constant 0 : index
    %139 = vector.load %arg4[%c224, %c0_38] : memref<240x256xf32, #tpu.memory_space<vmem>>, vector<8x256xf32>
    %140 = vector.broadcast %138 : vector<1x256xf32> to vector<8x256xf32>
    %141 = arith.mulf %140, %139 : vector<8x256xf32>
    %142 = arith.addf %137, %141 : vector<8x256xf32>
    %143 = vector.extract_strided_slice %142 {offsets = [0, 0], sizes = [3, 256], strides = [1, 1]} : vector<8x256xf32> to vector<3x256xf32>
    %144 = arith.negf %143 : vector<3x256xf32>
    %145 = math.exp %144 : vector<3x256xf32>
    %cst_39 = arith.constant 1.000000e+00 : f32
    %146 = vector.broadcast %cst_39 : f32 to vector<3x256xf32>
    %147 = arith.addf %146, %145 : vector<3x256xf32>
    %148 = arith.divf %146, %147 : vector<3x256xf32>
    %c0_40 = arith.constant 0 : index
    %c0_41 = arith.constant 0 : index
    %c0_42 = arith.constant 0 : index
    %149 = vector.load %arg3[%c0_40, %c0_41, %c0_42] : memref<2x3x256xf32, #tpu.memory_space<vmem>>, vector<1x3x256xf32>
    %150 = vector.shape_cast %149 : vector<1x3x256xf32> to vector<3x256xf32>
    %151 = vector.shape_cast %148 : vector<3x256xf32> to vector<1x3x256xf32>
    tpu.vector_store %arg3[%c0_40, %c0_41, %c0_42], %151 {strides = array<i32>} : memref<2x3x256xf32, #tpu.memory_space<vmem>>, vector<1x3x256xf32>,
    %c16_43 = arith.constant 16 : index
    %c0_44 = arith.constant 0 : index
    %152 = vector.load %arg4[%c16_43, %c0_44] : memref<240x256xf32, #tpu.memory_space<vmem>>, vector<8x256xf32>
    %c1_45 = arith.constant 1 : index
    %c0_46 = arith.constant 0 : index
    %153 = memref.load %arg1[%c1_45, %c0_46] : memref<2x2xf32, #tpu.memory_space<smem>>
    %c0_47 = arith.constant 0 : index
    %c0_48 = arith.constant 0 : index
    %154 = vector.load %arg4[%c0_47, %c0_48] : memref<240x256xf32, #tpu.memory_space<vmem>>, vector<8x256xf32>
    %155 = vector.broadcast %153 : f32 to vector<8x256xf32>
    %156 = arith.mulf %155, %154 : vector<8x256xf32>
    %157 = arith.addf %152, %156 : vector<8x256xf32>
    %c1_49 = arith.constant 1 : index
    %c1_50 = arith.constant 1 : index
    %158 = memref.load %arg1[%c1_49, %c1_50] : memref<2x2xf32, #tpu.memory_space<smem>>
    %c8_51 = arith.constant 8 : index
    %c0_52 = arith.constant 0 : index
    %159 = vector.load %arg4[%c8_51, %c0_52] : memref<240x256xf32, #tpu.memory_space<vmem>>, vector<8x256xf32>
    %160 = vector.broadcast %158 : f32 to vector<8x256xf32>
    %161 = arith.mulf %160, %159 : vector<8x256xf32>
    %162 = arith.addf %157, %161 : vector<8x256xf32>
    %cst_53 = arith.constant 0.000000e+00 : f32
    %163 = vector.broadcast %cst_53 : f32 to vector<8x256xf32>
    %164 = arith.maximumf %162, %163 : vector<8x256xf32>
    %c88_54 = arith.constant 88 : index
    %c0_55 = arith.constant 0 : index
    %165 = vector.load %arg4[%c88_54, %c0_55] : memref<240x256xf32, #tpu.memory_space<vmem>>, vector<8x256xf32>
    %166 = vector.extract_strided_slice %164 {offsets = [0, 0], sizes = [1, 256], strides = [1, 1]} : vector<8x256xf32> to vector<1x256xf32>
    %c24_56 = arith.constant 24 : index
    %c0_57 = arith.constant 0 : index
    %167 = vector.load %arg4[%c24_56, %c0_57] : memref<240x256xf32, #tpu.memory_space<vmem>>, vector<8x256xf32>
    %168 = vector.broadcast %166 : vector<1x256xf32> to vector<8x256xf32>
    %169 = arith.mulf %168, %167 : vector<8x256xf32>
    %170 = arith.addf %165, %169 : vector<8x256xf32>
    %171 = vector.extract_strided_slice %164 {offsets = [1, 0], sizes = [1, 256], strides = [1, 1]} : vector<8x256xf32> to vector<1x256xf32>
    %c32_58 = arith.constant 32 : index
    %c0_59 = arith.constant 0 : index
    %172 = vector.load %arg4[%c32_58, %c0_59] : memref<240x256xf32, #tpu.memory_space<vmem>>, vector<8x256xf32>
    %173 = vector.broadcast %171 : vector<1x256xf32> to vector<8x256xf32>
    %174 = arith.mulf %173, %172 : vector<8x256xf32>
    %175 = arith.addf %170, %174 : vector<8x256xf32>
    %176 = vector.extract_strided_slice %164 {offsets = [2, 0], sizes = [1, 256], strides = [1, 1]} : vector<8x256xf32> to vector<1x256xf32>
    %c40_60 = arith.constant 40 : index
    %c0_61 = arith.constant 0 : index
    %177 = vector.load %arg4[%c40_60, %c0_61] : memref<240x256xf32, #tpu.memory_space<vmem>>, vector<8x256xf32>
    %178 = vector.broadcast %176 : vector<1x256xf32> to vector<8x256xf32>
    %179 = arith.mulf %178, %177 : vector<8x256xf32>
    %180 = arith.addf %175, %179 : vector<8x256xf32>
    %181 = vector.extract_strided_slice %164 {offsets = [3, 0], sizes = [1, 256], strides = [1, 1]} : vector<8x256xf32> to vector<1x256xf32>
    %c48_62 = arith.constant 48 : index
    %c0_63 = arith.constant 0 : index
    %182 = vector.load %arg4[%c48_62, %c0_63] : memref<240x256xf32, #tpu.memory_space<vmem>>, vector<8x256xf32>
    %183 = vector.broadcast %181 : vector<1x256xf32> to vector<8x256xf32>
    %184 = arith.mulf %183, %182 : vector<8x256xf32>
    %185 = arith.addf %180, %184 : vector<8x256xf32>
    %186 = vector.extract_strided_slice %164 {offsets = [4, 0], sizes = [1, 256], strides = [1, 1]} : vector<8x256xf32> to vector<1x256xf32>
    %c56_64 = arith.constant 56 : index
    %c0_65 = arith.constant 0 : index
    %187 = vector.load %arg4[%c56_64, %c0_65] : memref<240x256xf32, #tpu.memory_space<vmem>>, vector<8x256xf32>
    %188 = vector.broadcast %186 : vector<1x256xf32> to vector<8x256xf32>
    %189 = arith.mulf %188, %187 : vector<8x256xf32>
    %190 = arith.addf %185, %189 : vector<8x256xf32>
    %191 = vector.extract_strided_slice %164 {offsets = [5, 0], sizes = [1, 256], strides = [1, 1]} : vector<8x256xf32> to vector<1x256xf32>
    %c64_66 = arith.constant 64 : index
    %c0_67 = arith.constant 0 : index
    %192 = vector.load %arg4[%c64_66, %c0_67] : memref<240x256xf32, #tpu.memory_space<vmem>>, vector<8x256xf32>
    %193 = vector.broadcast %191 : vector<1x256xf32> to vector<8x256xf32>
    %194 = arith.mulf %193, %192 : vector<8x256xf32>
    %195 = arith.addf %190, %194 : vector<8x256xf32>
    %196 = vector.extract_strided_slice %164 {offsets = [6, 0], sizes = [1, 256], strides = [1, 1]} : vector<8x256xf32> to vector<1x256xf32>
    %c72_68 = arith.constant 72 : index
    %c0_69 = arith.constant 0 : index
    %197 = vector.load %arg4[%c72_68, %c0_69] : memref<240x256xf32, #tpu.memory_space<vmem>>, vector<8x256xf32>
    %198 = vector.broadcast %196 : vector<1x256xf32> to vector<8x256xf32>
    %199 = arith.mulf %198, %197 : vector<8x256xf32>
    %200 = arith.addf %195, %199 : vector<8x256xf32>
    %201 = vector.extract_strided_slice %164 {offsets = [7, 0], sizes = [1, 256], strides = [1, 1]} : vector<8x256xf32> to vector<1x256xf32>
    %c80_70 = arith.constant 80 : index
    %c0_71 = arith.constant 0 : index
    %202 = vector.load %arg4[%c80_70, %c0_71] : memref<240x256xf32, #tpu.memory_space<vmem>>, vector<8x256xf32>
    %203 = vector.broadcast %201 : vector<1x256xf32> to vector<8x256xf32>
    %204 = arith.mulf %203, %202 : vector<8x256xf32>
    %205 = arith.addf %200, %204 : vector<8x256xf32>
    %cst_72 = arith.constant 0.000000e+00 : f32
    %206 = vector.broadcast %cst_72 : f32 to vector<8x256xf32>
    %207 = arith.maximumf %205, %206 : vector<8x256xf32>
    %c160_73 = arith.constant 160 : index
    %c0_74 = arith.constant 0 : index
    %208 = vector.load %arg4[%c160_73, %c0_74] : memref<240x256xf32, #tpu.memory_space<vmem>>, vector<8x256xf32>
    %209 = vector.extract_strided_slice %207 {offsets = [0, 0], sizes = [1, 256], strides = [1, 1]} : vector<8x256xf32> to vector<1x256xf32>
    %c96_75 = arith.constant 96 : index
    %c0_76 = arith.constant 0 : index
    %210 = vector.load %arg4[%c96_75, %c0_76] : memref<240x256xf32, #tpu.memory_space<vmem>>, vector<8x256xf32>
    %211 = vector.broadcast %209 : vector<1x256xf32> to vector<8x256xf32>
    %212 = arith.mulf %211, %210 : vector<8x256xf32>
    %213 = arith.addf %208, %212 : vector<8x256xf32>
    %214 = vector.extract_strided_slice %207 {offsets = [1, 0], sizes = [1, 256], strides = [1, 1]} : vector<8x256xf32> to vector<1x256xf32>
    %c104_77 = arith.constant 104 : index
    %c0_78 = arith.constant 0 : index
    %215 = vector.load %arg4[%c104_77, %c0_78] : memref<240x256xf32, #tpu.memory_space<vmem>>, vector<8x256xf32>
    %216 = vector.broadcast %214 : vector<1x256xf32> to vector<8x256xf32>
    %217 = arith.mulf %216, %215 : vector<8x256xf32>
    %218 = arith.addf %213, %217 : vector<8x256xf32>
    %219 = vector.extract_strided_slice %207 {offsets = [2, 0], sizes = [1, 256], strides = [1, 1]} : vector<8x256xf32> to vector<1x256xf32>
    %c112_79 = arith.constant 112 : index
    %c0_80 = arith.constant 0 : index
    %220 = vector.load %arg4[%c112_79, %c0_80] : memref<240x256xf32, #tpu.memory_space<vmem>>, vector<8x256xf32>
    %221 = vector.broadcast %219 : vector<1x256xf32> to vector<8x256xf32>
    %222 = arith.mulf %221, %220 : vector<8x256xf32>
    %223 = arith.addf %218, %222 : vector<8x256xf32>
    %224 = vector.extract_strided_slice %207 {offsets = [3, 0], sizes = [1, 256], strides = [1, 1]} : vector<8x256xf32> to vector<1x256xf32>
    %c120_81 = arith.constant 120 : index
    %c0_82 = arith.constant 0 : index
    %225 = vector.load %arg4[%c120_81, %c0_82] : memref<240x256xf32, #tpu.memory_space<vmem>>, vector<8x256xf32>
    %226 = vector.broadcast %224 : vector<1x256xf32> to vector<8x256xf32>
    %227 = arith.mulf %226, %225 : vector<8x256xf32>
    %228 = arith.addf %223, %227 : vector<8x256xf32>
    %229 = vector.extract_strided_slice %207 {offsets = [4, 0], sizes = [1, 256], strides = [1, 1]} : vector<8x256xf32> to vector<1x256xf32>
    %c128_83 = arith.constant 128 : index
    %c0_84 = arith.constant 0 : index
    %230 = vector.load %arg4[%c128_83, %c0_84] : memref<240x256xf32, #tpu.memory_space<vmem>>, vector<8x256xf32>
    %231 = vector.broadcast %229 : vector<1x256xf32> to vector<8x256xf32>
    %232 = arith.mulf %231, %230 : vector<8x256xf32>
    %233 = arith.addf %228, %232 : vector<8x256xf32>
    %234 = vector.extract_strided_slice %207 {offsets = [5, 0], sizes = [1, 256], strides = [1, 1]} : vector<8x256xf32> to vector<1x256xf32>
    %c136_85 = arith.constant 136 : index
    %c0_86 = arith.constant 0 : index
    %235 = vector.load %arg4[%c136_85, %c0_86] : memref<240x256xf32, #tpu.memory_space<vmem>>, vector<8x256xf32>
    %236 = vector.broadcast %234 : vector<1x256xf32> to vector<8x256xf32>
    %237 = arith.mulf %236, %235 : vector<8x256xf32>
    %238 = arith.addf %233, %237 : vector<8x256xf32>
    %239 = vector.extract_strided_slice %207 {offsets = [6, 0], sizes = [1, 256], strides = [1, 1]} : vector<8x256xf32> to vector<1x256xf32>
    %c144_87 = arith.constant 144 : index
    %c0_88 = arith.constant 0 : index
    %240 = vector.load %arg4[%c144_87, %c0_88] : memref<240x256xf32, #tpu.memory_space<vmem>>, vector<8x256xf32>
    %241 = vector.broadcast %239 : vector<1x256xf32> to vector<8x256xf32>
    %242 = arith.mulf %241, %240 : vector<8x256xf32>
    %243 = arith.addf %238, %242 : vector<8x256xf32>
    %244 = vector.extract_strided_slice %207 {offsets = [7, 0], sizes = [1, 256], strides = [1, 1]} : vector<8x256xf32> to vector<1x256xf32>
    %c152_89 = arith.constant 152 : index
    %c0_90 = arith.constant 0 : index
    %245 = vector.load %arg4[%c152_89, %c0_90] : memref<240x256xf32, #tpu.memory_space<vmem>>, vector<8x256xf32>
    %246 = vector.broadcast %244 : vector<1x256xf32> to vector<8x256xf32>
    %247 = arith.mulf %246, %245 : vector<8x256xf32>
    %248 = arith.addf %243, %247 : vector<8x256xf32>
    %cst_91 = arith.constant 0.000000e+00 : f32
    %249 = vector.broadcast %cst_91 : f32 to vector<8x256xf32>
    %250 = arith.maximumf %248, %249 : vector<8x256xf32>
    %c232_92 = arith.constant 232 : index
    %c0_93 = arith.constant 0 : index
    %251 = vector.load %arg4[%c232_92, %c0_93] : memref<240x256xf32, #tpu.memory_space<vmem>>, vector<8x256xf32>
    %252 = vector.extract_strided_slice %250 {offsets = [0, 0], sizes = [1, 256], strides = [1, 1]} : vector<8x256xf32> to vector<1x256xf32>
    %c168_94 = arith.constant 168 : index
    %c0_95 = arith.constant 0 : index
    %253 = vector.load %arg4[%c168_94, %c0_95] : memref<240x256xf32, #tpu.memory_space<vmem>>, vector<8x256xf32>
    %254 = vector.broadcast %252 : vector<1x256xf32> to vector<8x256xf32>
    %255 = arith.mulf %254, %253 : vector<8x256xf32>
    %256 = arith.addf %251, %255 : vector<8x256xf32>
    %257 = vector.extract_strided_slice %250 {offsets = [1, 0], sizes = [1, 256], strides = [1, 1]} : vector<8x256xf32> to vector<1x256xf32>
    %c176_96 = arith.constant 176 : index
    %c0_97 = arith.constant 0 : index
    %258 = vector.load %arg4[%c176_96, %c0_97] : memref<240x256xf32, #tpu.memory_space<vmem>>, vector<8x256xf32>
    %259 = vector.broadcast %257 : vector<1x256xf32> to vector<8x256xf32>
    %260 = arith.mulf %259, %258 : vector<8x256xf32>
    %261 = arith.addf %256, %260 : vector<8x256xf32>
    %262 = vector.extract_strided_slice %250 {offsets = [2, 0], sizes = [1, 256], strides = [1, 1]} : vector<8x256xf32> to vector<1x256xf32>
    %c184_98 = arith.constant 184 : index
    %c0_99 = arith.constant 0 : index
    %263 = vector.load %arg4[%c184_98, %c0_99] : memref<240x256xf32, #tpu.memory_space<vmem>>, vector<8x256xf32>
    %264 = vector.broadcast %262 : vector<1x256xf32> to vector<8x256xf32>
    %265 = arith.mulf %264, %263 : vector<8x256xf32>
    %266 = arith.addf %261, %265 : vector<8x256xf32>
    %267 = vector.extract_strided_slice %250 {offsets = [3, 0], sizes = [1, 256], strides = [1, 1]} : vector<8x256xf32> to vector<1x256xf32>
    %c192_100 = arith.constant 192 : index
    %c0_101 = arith.constant 0 : index
    %268 = vector.load %arg4[%c192_100, %c0_101] : memref<240x256xf32, #tpu.memory_space<vmem>>, vector<8x256xf32>
    %269 = vector.broadcast %267 : vector<1x256xf32> to vector<8x256xf32>
    %270 = arith.mulf %269, %268 : vector<8x256xf32>
    %271 = arith.addf %266, %270 : vector<8x256xf32>
    %272 = vector.extract_strided_slice %250 {offsets = [4, 0], sizes = [1, 256], strides = [1, 1]} : vector<8x256xf32> to vector<1x256xf32>
    %c200_102 = arith.constant 200 : index
    %c0_103 = arith.constant 0 : index
    %273 = vector.load %arg4[%c200_102, %c0_103] : memref<240x256xf32, #tpu.memory_space<vmem>>, vector<8x256xf32>
    %274 = vector.broadcast %272 : vector<1x256xf32> to vector<8x256xf32>
    %275 = arith.mulf %274, %273 : vector<8x256xf32>
    %276 = arith.addf %271, %275 : vector<8x256xf32>
    %277 = vector.extract_strided_slice %250 {offsets = [5, 0], sizes = [1, 256], strides = [1, 1]} : vector<8x256xf32> to vector<1x256xf32>
    %c208_104 = arith.constant 208 : index
    %c0_105 = arith.constant 0 : index
    %278 = vector.load %arg4[%c208_104, %c0_105] : memref<240x256xf32, #tpu.memory_space<vmem>>, vector<8x256xf32>
    %279 = vector.broadcast %277 : vector<1x256xf32> to vector<8x256xf32>
    %280 = arith.mulf %279, %278 : vector<8x256xf32>
    %281 = arith.addf %276, %280 : vector<8x256xf32>
    %282 = vector.extract_strided_slice %250 {offsets = [6, 0], sizes = [1, 256], strides = [1, 1]} : vector<8x256xf32> to vector<1x256xf32>
    %c216_106 = arith.constant 216 : index
    %c0_107 = arith.constant 0 : index
    %283 = vector.load %arg4[%c216_106, %c0_107] : memref<240x256xf32, #tpu.memory_space<vmem>>, vector<8x256xf32>
    %284 = vector.broadcast %282 : vector<1x256xf32> to vector<8x256xf32>
    %285 = arith.mulf %284, %283 : vector<8x256xf32>
    %286 = arith.addf %281, %285 : vector<8x256xf32>
    %287 = vector.extract_strided_slice %250 {offsets = [7, 0], sizes = [1, 256], strides = [1, 1]} : vector<8x256xf32> to vector<1x256xf32>
    %c224_108 = arith.constant 224 : index
    %c0_109 = arith.constant 0 : index
    %288 = vector.load %arg4[%c224_108, %c0_109] : memref<240x256xf32, #tpu.memory_space<vmem>>, vector<8x256xf32>
    %289 = vector.broadcast %287 : vector<1x256xf32> to vector<8x256xf32>
    %290 = arith.mulf %289, %288 : vector<8x256xf32>
    %291 = arith.addf %286, %290 : vector<8x256xf32>
    %292 = vector.extract_strided_slice %291 {offsets = [0, 0], sizes = [3, 256], strides = [1, 1]} : vector<8x256xf32> to vector<3x256xf32>
    %293 = arith.negf %292 : vector<3x256xf32>
    %294 = math.exp %293 : vector<3x256xf32>
    %cst_110 = arith.constant 1.000000e+00 : f32
    %295 = vector.broadcast %cst_110 : f32 to vector<3x256xf32>
    %296 = arith.addf %295, %294 : vector<3x256xf32>
    %297 = arith.divf %295, %296 : vector<3x256xf32>
    %c1_111 = arith.constant 1 : index
    %c0_112 = arith.constant 0 : index
    %c0_113 = arith.constant 0 : index
    %298 = vector.load %arg3[%c1_111, %c0_112, %c0_113] : memref<2x3x256xf32, #tpu.memory_space<vmem>>, vector<1x3x256xf32>
    %299 = vector.shape_cast %298 : vector<1x3x256xf32> to vector<3x256xf32>
    %300 = vector.shape_cast %297 : vector<3x256xf32> to vector<1x3x256xf32>
    tpu.vector_store %arg3[%c1_111, %c0_112, %c0_113], %300 {strides = array<i32>} : memref<2x3x256xf32, #tpu.memory_space<vmem>>, vector<1x3x256xf32>,
    return
  }
  func.func @transform_0(%arg0: i32) -> (i32, i32) {
    %c0_i32 = arith.constant 0 : i32
    %c0_i32_0 = arith.constant 0 : i32
    %c0_i32_1 = arith.constant 0 : i32
    return %c0_i32, %c0_i32_0 : i32, i32
  }
  func.func @transform_1(%arg0: i32) -> (i32, i32) {
    %c0_i32 = arith.constant 0 : i32
    %c0_i32_0 = arith.constant 0 : i32
    return %c0_i32, %arg0 : i32, i32
  }
  func.func @transform_2(%arg0: i32) -> (i32, i32, i32) {
    %c0_i32 = arith.constant 0 : i32
    %c0_i32_0 = arith.constant 0 : i32
    %c0_i32_1 = arith.constant 0 : i32
    return %c0_i32, %c0_i32_0, %arg0 : i32, i32, i32
  }
}

</mosaic_0001>

<bundles_post_ra>
// kernel: true_pixelwise_mlp_relight.1
= control target key start
LH: loop header
LB: loop body
LE: loop exit
PB: predicated region body
PF: predicated region fallthrough
CT: control target
= control target key end

     0   :  { %7 = vsyncpa [#allocation5], 0  ;;  %s1617_s0 = inlined_call_operand.hbm [shape: f32[2,2], index: 0, kind: input, shape index: {}]   ;;  %s1618_s1 = inlined_call_operand.hbm [shape: bf16[240,256], index: 1, kind: input, shape index: {}]   ;;  %s1619_s2 = inlined_call_operand.vmem [shape: f32[2,3,256], index: 2, kind: output, shape index: {}]  }
   0x1   :  { %8 = vsyncpa [#allocation4], 0  ;;  %s987_s11 = scalar_lea.hbm %s1617_s0, 32 }
   0x2   :  { %p988_p0 = scmp.ne.s32.totalorder %s1617_s0, %s987_s11  ;;  %p991_p1 = scmp.lt.u32.totalorder %s987_s11, %s1617_s0 }
   0x4   :  { %p993_p2 = pnand %p991_p1, %p988_p0 }
   0x6   :  { %996 = shalt.err (!%p993_p2)
}
   0x7   :  { %s1023_s16 = smov [#allocation3]   ;;  %s1024_s19 = smov [#allocation6]  }
   0x8   :  { %16 = dma.hbm_to_smem %s1617_s0, 32, %s1023_s16, [#allocation5]  }
   0x9   :  { %s22_s20 = sshll.u32 %s1024_s19, 4  ;;  %s997_s23 = scalar_lea.hbm %s1618_s1, 3840  ;;  %s23_s20 = int_to_ptr.vmem [resolvable:$true] %s22_s20 }
   0xa   :  { %p998_p3 = scmp.ne.s32.totalorder %s1618_s1, %s997_s23  ;;  %p1001_p4 = scmp.lt.u32.totalorder %s997_s23, %s1618_s1 }
   0xc   :  { %p1003_p5 = pnand %p1001_p4, %p998_p3 }
   0xe   :  { %1006 = shalt.err (!%p1003_p5)
}
   0xf   :  { %s1007_s28 = scalar_lea.vmem %s23_s20, 3840  ;;  %p1012_p7 = scmp.lt.s32.totalorder %s23_s20, %s23_s20 }
  0x10   :  { %p1008_p6 = scmp.ne.s32.totalorder %s23_s20, %s1007_s28  ;;  %p1013_p8 = scmp.lt.s32.totalorder %s1007_s28, %s1007_s28 }
  0x12   :  { %p1014_p9 = por %p1013_p8, %p1012_p7 }
  0x14   :  { %p1015_p10 = pnand %p1014_p9, %p1008_p6 }
  0x16   :  { %1018 = shalt.err (!%p1015_p10)
}
  0x17   :  { %s1025_s0 = smov 128   ;;  %s1026_s29 = smov 8  }
  0x18   :  { %28 = dma.hbm_to_vmem [thread:$0]  %s1618_s1, 3840, %s23_s20, [#allocation4], %s1025_s0, %s1025_s0, %s1026_s29  }
  0x19   :  { %1019 = dma.done.wait [#allocation5], 32  }
  0x1a   :  { %1020 = vsyncadd [#allocation5], 4294967264 }
  0x1b   :  { %1021 = dma.done.wait [#allocation4], 3840  }
  0x1c   :  { %1022 = vsyncadd [#allocation4], 4294963456 }
  0x1d   :  { %35 = sfence }
  0x1e   :  { %v1066_v0 = vld [vmem:[#allocation6] sm:$0xff]  ;;  %v1068_v1 = vld [vmem:[#allocation6 + $0x8] sm:$0xff]  ;;  %v1070_v2 = vld [vmem:[#allocation6 + $0x10] sm:$0xff]  ;;  %v210_v8 = vlaneseq  ;;  %s1097_s1 = sld [smem:[#allocation3]]  ;;  %s1107_s4 = sld [smem:[#allocation3 + $0x1]] }
  0x1f   :  { %v1072_v3 = vld [vmem:[#allocation6 + $0x18] sm:$0xff]  ;;  %v1074_v4 = vld [vmem:[#allocation6 + $0x20] sm:$0xff]  ;;  %v1076_v5 = vld [vmem:[#allocation6 + $0x28] sm:$0xff]  ;;  %v66_v7 = vunpack.c.l.bf16 %v1066_v0  ;;  %v67_v11 = vunpack.c.h.bf16 %v1066_v0  ;;  %v68_v12 = vunpack.c.l.bf16 %v1068_v1  ;;  %v69_v13 = vunpack.c.h.bf16 %v1068_v1  ;;  %s1109_s5 = sld [smem:[#allocation3 + $0x80]]  ;;  %s1147_s6 = sld [smem:[#allocation3 + $0x81]] }
  0x20   :  { %v1078_v6 = vld [vmem:[#allocation6 + $0x30] sm:$0xff]  ;;  %v1081_v9 = vld [vmem:[#allocation6 + $0x38] sm:$0xff]  ;;  %v1083_v10 = vld [vmem:[#allocation6 + $0x40] sm:$0xff]  ;;  %v70_v14 = vunpack.c.l.bf16 %v1070_v2  ;;  %v71_v17 = vunpack.c.h.bf16 %v1070_v2  ;;  %v72_v18 = vunpack.c.l.bf16 %v1072_v3  ;;  %v1620_v19 = vunpack.c.h.bf16 %v1072_v3 }
  0x21   :  { %v1089_v15 = vld [vmem:[#allocation6 + $0x48] sm:$0xff]  ;;  %v1091_v16 = vld [vmem:[#allocation6 + $0x50] sm:$0xff]  ;;  %v74_v20 = vunpack.c.l.bf16 %v1074_v4  ;;  %v1099_v21 = vld [vmem:[#allocation6 + $0x58] sm:$0xff]  ;;  %v1621_v23 = vunpack.c.h.bf16 %v1074_v4  ;;  %v76_v24 = vunpack.c.l.bf16 %v1076_v5  ;;  %v1624_v25 = vunpack.c.h.bf16 %v1076_v5 }
  0x22   :  { %v1101_v22 = vld [vmem:[#allocation6 + $0x60] sm:$0xff]  ;;  %v78_v26 = vunpack.c.l.bf16 %v1078_v6  ;;  %v1111_v27 = vld [vmem:[#allocation6 + $0x68] sm:$0xff]  ;;  %v1113_v28 = vld [vmem:[#allocation6 + $0x70] sm:$0xff]  ;;  %v1626_v29 = vunpack.c.h.bf16 %v1078_v6  ;;  %v1625_v30 = vunpack.c.l.bf16 %v1081_v9  ;;  %v81_v31 = vunpack.c.h.bf16 %v1081_v9 }
  0x23   :  { %v1627_v32 = vunpack.c.l.bf16 %v1083_v10  ;;  %v1119_v33 = vld [vmem:[#allocation6 + $0x78] sm:$0xff]  ;;  %v1121_v34 = vld [vmem:[#allocation6 + $0x80] sm:$0xff]  ;;  %v1127_v39 = vld [vmem:[#allocation6 + $0x88] sm:$0xff]  ;;  %v1623_v42 = vunpack.c.l.bf16 %v1099_v21  ;;  %v1622_v43 = vunpack.c.h.bf16 %v1099_v21  ;;  %v211_v57 = vshrl.u32 %v210_v8, 7 }
  0x24   :  { %v1129_v40 = vld [vmem:[#allocation6 + $0x90] sm:$0xff]  ;;  %v1135_v45 = vld [vmem:[#allocation6 + $0x98] sm:$0xff]  ;;  %v1137_v46 = vld [vmem:[#allocation6 + $0xa0] sm:$0xff]  ;;  %v191_v55 = vstv %s1097_s1  ;;  %v199_v56 = vstv %s1107_s4 }
  0x25   :  { %v1153_v59 = vld [vmem:[#allocation6 + $0xa8] sm:$0xff]  ;;  %v1155_v60 = vld [vmem:[#allocation6 + $0xb0] sm:$0xff]  ;;  %v1161_v53 = vld [vmem:[#allocation6 + $0xb8] sm:$0xff]  ;;  %v574_v52 = vstv %s1109_s5  ;;  %v192_v58 = vmul.f32 %v191_v55, %v66_v7  ;;  %v193_v51 = vmul.f32 %v191_v55, %v67_v11  ;;  %v200_v62 = vmul.f32 %v199_v56, %v68_v12 }
  0x26   :  { %v201_v63 = vmul.f32 %v199_v56, %v69_v13  ;;  %v1186_v44 = vsub.s32 0, %v211_v57  ;;  %v575_v54 = vmul.f32 %v574_v52, %v66_v7  ;;  %v576_v50 = vmul.f32 %v574_v52, %v67_v11 }
  0x27   :  { %v194_v55 = vadd.f32 %v192_v58, %v70_v14  ;;  %v195_v47 = vadd.f32 %v193_v51, %v71_v17  ;;  %v1192_v61 = vsub.s32 1, %v211_v57  ;;  %v582_v48 = vstv %s1147_s6 }
  0x28   :  { %v1195_v41 = vsub.s32 2, %v211_v57  ;;  %v1197_v58 = vsub.s32 3, %v211_v57  ;;  %v1199_v51 = vsub.s32 4, %v211_v57  ;;  %v1201_v56 = vsub.s32 5, %v211_v57 }
  0x29   :  { %v202_v8 = vadd.f32 %v200_v62, %v194_v55  ;;  %v203_v49 = vadd.f32 %v201_v63, %v195_v47  ;;  %v1203_v36 = vsub.s32 6, %v211_v57  ;;  %v1205_v7 = vsub.s32 7, %v211_v57 }
  0x2a   :  { %v577_v0 = vadd.f32 %v575_v54, %v70_v14  ;;  %v578_v11 = vadd.f32 %v576_v50, %v71_v17  ;;  %v583_v47 = vmul.f32 %v582_v48, %v68_v12  ;;  %v584_v52 = vmul.f32 %v582_v48, %v69_v13 }
  0x2b   :  { %v204_v38 = vmax.f32 %v202_v8, 0.0  ;;  %v205_v37 = vmax.f32 %v203_v49, 0.0 }
  0x2c   :  { %v585_v55 = vadd.f32 %v583_v47, %v577_v0  ;;  %v586_v35 = vadd.f32 %v584_v52, %v578_v11 }
  0x2d   :  { %v213_v62 = vrot.slane %v204_v38, %v1186_v44  ;;  %v217_v49 = vrot.slane %v205_v37, %v1186_v44  ;;  %v227_v63 = vrot.slane %v204_v38, %v1192_v61  ;;  %v231_v57 = vrot.slane %v205_v37, %v1192_v61 }
  0x2e   :  { %v241_v8 = vrot.slane %v204_v38, %v1195_v41  ;;  %v245_v14 = vrot.slane %v205_v37, %v1195_v41  ;;  %v255_v2 = vrot.slane %v204_v38, %v1197_v58  ;;  %v259_v17 = vrot.slane %v205_v37, %v1197_v58 }
  0x2f   :  { %v218_v1 = vmul.f32 %v213_v62, %v72_v18  ;;  %v219_v12 = vmul.f32 %v217_v49, %v1620_v19  ;;  %v232_v13 = vmul.f32 %v227_v63, %v74_v20  ;;  %v233_v48 = vmul.f32 %v231_v57, %v1621_v23 }
  0x30   :  { %v246_v50 = vmul.f32 %v241_v8, %v76_v24  ;;  %v247_v54 = vmul.f32 %v245_v14, %v1624_v25  ;;  %v269_v19 = vrot.slane %v204_v38, %v1199_v51  ;;  %v273_v63 = vrot.slane %v205_v37, %v1199_v51 }
  0x31   :  { %v220_v62 = vadd.f32 %v218_v1, %v1623_v42  ;;  %v221_v49 = vadd.f32 %v219_v12, %v1622_v43  ;;  %v283_v57 = vrot.slane %v204_v38, %v1201_v56  ;;  %v287_v23 = vrot.slane %v205_v37, %v1201_v56 }
  0x32   :  { %v297_v8 = vrot.slane %v204_v38, %v1203_v36  ;;  %v301_v14 = vrot.slane %v205_v37, %v1203_v36  ;;  %v260_v47 = vmul.f32 %v255_v2, %v78_v26  ;;  %v261_v52 = vmul.f32 %v259_v17, %v1626_v29 }
  0x33   :  { %v234_v0 = vadd.f32 %v232_v13, %v220_v62  ;;  %v235_v11 = vadd.f32 %v233_v48, %v221_v49  ;;  %v274_v1 = vmul.f32 %v269_v19, %v1625_v30  ;;  %v275_v12 = vmul.f32 %v273_v63, %v81_v31 }
  0x34   :  { %v288_v43 = vmul.f32 %v283_v57, %v1627_v32  ;;  %v1633_v42 = vunpack.c.h.bf16 %v1083_v10  ;;  %v311_v62 = vrot.slane %v204_v38, %v1205_v7  ;;  %v315_v2 = vrot.slane %v205_v37, %v1205_v7 }
  0x35   :  { %v248_v13 = vadd.f32 %v246_v50, %v234_v0  ;;  %v249_v48 = vadd.f32 %v247_v54, %v235_v11  ;;  %v1634_v17 = vunpack.c.l.bf16 %v1089_v15  ;;  %v1635_v19 = vunpack.c.h.bf16 %v1089_v15 }
  0x36   :  { %v289_v25 = vmul.f32 %v287_v23, %v1633_v42  ;;  %v1263_v29 = vmax.f32 %v585_v55, 0.0  ;;  %v1265_v63 = vmax.f32 %v586_v35, 0.0  ;;  %v1636_v23 = vunpack.c.l.bf16 %v1091_v16 }
  0x37   :  { %v302_v49 = vmul.f32 %v297_v8, %v1634_v17  ;;  %v303_v30 = vmul.f32 %v301_v14, %v1635_v19  ;;  %v262_v57 = vadd.f32 %v260_v47, %v248_v13  ;;  %v263_v32 = vadd.f32 %v261_v52, %v249_v48 }
  0x38   :  { %v316_v42 = vmul.f32 %v311_v62, %v1636_v23  ;;  %v1637_v50 = vunpack.c.h.bf16 %v1091_v16  ;;  %v596_v37 = vrot.slane %v1263_v29, %v1186_v44  ;;  %v600_v54 = vrot.slane %v1265_v63, %v1186_v44 }
  0x39   :  { %v610_v55 = vrot.slane %v1263_v29, %v1192_v61  ;;  %v614_v35 = vrot.slane %v1265_v63, %v1192_v61  ;;  %v276_v8 = vadd.f32 %v274_v1, %v262_v57  ;;  %v277_v14 = vadd.f32 %v275_v12, %v263_v32  ;;  %v1291_v1 = vld [vmem:[#allocation6 + $0xc0] sm:$0xff] }
  0x3a   :  { %v317_v38 = vmul.f32 %v315_v2, %v1637_v50  ;;  %v624_v0 = vrot.slane %v1263_v29, %v1195_v41  ;;  %v628_v11 = vrot.slane %v1265_v63, %v1195_v41  ;;  %v601_v47 = vmul.f32 %v596_v37, %v72_v18  ;;  %v1297_v18 = vld [vmem:[#allocation6 + $0xc8] sm:$0xff] }
  0x3b   :  { %v1638_v52 = vunpack.c.h.bf16 %v1072_v3  ;;  %v615_v48 = vmul.f32 %v610_v55, %v74_v20  ;;  %v1639_v62 = vunpack.c.h.bf16 %v1074_v4  ;;  %v290_v32 = vadd.f32 %v288_v43, %v276_v8 }
  0x3c   :  { %v291_v12 = vadd.f32 %v289_v25, %v277_v14  ;;  %v629_v17 = vmul.f32 %v624_v0, %v76_v24  ;;  %v1640_v19 = vunpack.c.h.bf16 %v1076_v5  ;;  %v1641_v3 = vunpack.c.l.bf16 %v1099_v21 }
  0x3d   :  { %v602_v13 = vmul.f32 %v600_v54, %v1638_v52  ;;  %v616_v2 = vmul.f32 %v614_v35, %v1639_v62  ;;  %v1642_v20 = vunpack.c.h.bf16 %v1099_v21  ;;  %v638_v4 = vrot.slane %v1263_v29, %v1197_v58 }
  0x3e   :  { %v630_v57 = vmul.f32 %v628_v11, %v1640_v19  ;;  %v603_v23 = vadd.f32 %v601_v47, %v1641_v3  ;;  %v642_v25 = vrot.slane %v1265_v63, %v1197_v58  ;;  %v304_v43 = vadd.f32 %v302_v49, %v290_v32 }
  0x3f   :  { %v604_v50 = vadd.f32 %v602_v13, %v1642_v20  ;;  %v305_v37 = vadd.f32 %v303_v30, %v291_v12  ;;  %v652_v5 = vrot.slane %v1263_v29, %v1199_v51  ;;  %v656_v24 = vrot.slane %v1265_v63, %v1199_v51 }
  0x40   :  { %v1628_v54 = vunpack.c.l.bf16 %v1291_v1  ;;  %v617_v21 = vadd.f32 %v615_v48, %v603_v23  ;;  %v318_v0 = vadd.f32 %v316_v42, %v304_v43  ;;  %v643_v30 = vmul.f32 %v638_v4, %v78_v26 }
  0x41   :  { %v618_v35 = vadd.f32 %v616_v2, %v604_v50  ;;  %v319_v11 = vadd.f32 %v317_v38, %v305_v37  ;;  %v1643_v49 = vunpack.c.h.bf16 %v1078_v6  ;;  %v1644_v52 = vunpack.c.l.bf16 %v1081_v9 }
  0x42   :  { %v658_v62 = vmul.f32 %v656_v24, %v81_v31  ;;  %v1323_v48 = vmax.f32 %v318_v0, 0.0  ;;  %v631_v32 = vadd.f32 %v629_v17, %v617_v21  ;;  %v666_v42 = vrot.slane %v1263_v29, %v1201_v56 }
  0x43   :  { %v644_v47 = vmul.f32 %v642_v25, %v1643_v49  ;;  %v657_v13 = vmul.f32 %v652_v5, %v1644_v52  ;;  %v1325_v2 = vmax.f32 %v319_v11, 0.0  ;;  %v632_v12 = vadd.f32 %v630_v57, %v618_v35 }
  0x44   :  { %v670_v26 = vrot.slane %v1265_v63, %v1201_v56  ;;  %v680_v6 = vrot.slane %v1263_v29, %v1203_v36  ;;  %v684_v38 = vrot.slane %v1265_v63, %v1203_v36  ;;  %v329_v9 = vrot.slane %v1323_v48, %v1186_v44 }
  0x45   :  { %v333_v31 = vrot.slane %v1325_v2, %v1186_v44  ;;  %v343_v17 = vrot.slane %v1323_v48, %v1192_v61  ;;  %v347_v19 = vrot.slane %v1325_v2, %v1192_v61  ;;  %v357_v57 = vrot.slane %v1323_v48, %v1195_v41 }
  0x46   :  { %v361_v3 = vrot.slane %v1325_v2, %v1195_v41  ;;  %v371_v23 = vrot.slane %v1323_v48, %v1197_v58  ;;  %v375_v20 = vrot.slane %v1325_v2, %v1197_v58  ;;  %v1645_v50 = vunpack.c.l.bf16 %v1101_v22 }
  0x47   :  { %v1646_v25 = vunpack.c.h.bf16 %v1101_v22  ;;  %v1647_v37 = vunpack.c.l.bf16 %v1111_v27  ;;  %v1648_v24 = vunpack.c.h.bf16 %v1111_v27  ;;  %v1649_v35 = vunpack.c.l.bf16 %v1113_v28 }
  0x48   :  { %v334_v4 = vmul.f32 %v329_v9, %v1645_v50  ;;  %v1650_v11 = vunpack.c.h.bf16 %v1113_v28  ;;  %v645_v52 = vadd.f32 %v643_v30, %v631_v32  ;;  %v646_v14 = vadd.f32 %v644_v47, %v632_v12 }
  0x49   :  { %v335_v43 = vmul.f32 %v333_v31, %v1646_v25  ;;  %v348_v5 = vmul.f32 %v343_v17, %v1647_v37  ;;  %v349_v21 = vmul.f32 %v347_v19, %v1648_v24  ;;  %v362_v0 = vmul.f32 %v357_v57, %v1649_v35 }
  0x4a   :  { %v363_v49 = vmul.f32 %v361_v3, %v1650_v11  ;;  %v1651_v8 = vunpack.c.l.bf16 %v1137_v46  ;;  %v1652_v50 = vunpack.c.h.bf16 %v1137_v46  ;;  %v385_v17 = vrot.slane %v1323_v48, %v1199_v51 }
  0x4b   :  { %v389_v19 = vrot.slane %v1325_v2, %v1199_v51  ;;  %v399_v57 = vrot.slane %v1323_v48, %v1201_v56  ;;  %v403_v3 = vrot.slane %v1325_v2, %v1201_v56  ;;  %v1653_v30 = vunpack.c.l.bf16 %v1083_v10 }
  0x4c   :  { %v336_v9 = vadd.f32 %v334_v4, %v1651_v8  ;;  %v337_v31 = vadd.f32 %v335_v43, %v1652_v50  ;;  %v1654_v8 = vunpack.c.h.bf16 %v1083_v10  ;;  %v1655_v25 = vunpack.c.l.bf16 %v1119_v33 }
  0x4d   :  { %v671_v47 = vmul.f32 %v666_v42, %v1653_v30  ;;  %v1656_v37 = vunpack.c.h.bf16 %v1119_v33  ;;  %v1657_v35 = vunpack.c.l.bf16 %v1121_v34  ;;  %v1658_v50 = vunpack.c.h.bf16 %v1121_v34 }
  0x4e   :  { %v672_v32 = vmul.f32 %v670_v26, %v1654_v8  ;;  %v350_v12 = vadd.f32 %v348_v5, %v336_v9  ;;  %v351_v4 = vadd.f32 %v349_v21, %v337_v31  ;;  %v376_v43 = vmul.f32 %v371_v23, %v1655_v25 }
  0x4f   :  { %v377_v24 = vmul.f32 %v375_v20, %v1656_v37  ;;  %v390_v11 = vmul.f32 %v385_v17, %v1657_v35  ;;  %v391_v55 = vmul.f32 %v389_v19, %v1658_v50  ;;  %v413_v42 = vrot.slane %v1323_v48, %v1203_v36 }
  0x50   :  { %v417_v10 = vrot.slane %v1325_v2, %v1203_v36  ;;  %v364_v26 = vadd.f32 %v362_v0, %v350_v12  ;;  %v365_v5 = vadd.f32 %v363_v49, %v351_v4  ;;  %v1659_v21 = vunpack.c.l.bf16 %v1127_v39  ;;  %v1413_v4 = vld [vmem:[#allocation6 + $0xd8] sm:$0xff] }
  0x51   :  { %v1660_v9 = vunpack.c.h.bf16 %v1127_v39  ;;  %v659_v31 = vadd.f32 %v657_v13, %v645_v52  ;;  %v660_v30 = vadd.f32 %v658_v62, %v646_v14  ;;  %v1661_v17 = vunpack.c.l.bf16 %v1089_v15  ;;  %v1407_v62 = vld [vmem:[#allocation6 + $0xd0] sm:$0xff] }
  0x52   :  { %v404_v23 = vmul.f32 %v399_v57, %v1659_v21  ;;  %v1662_v19 = vunpack.c.h.bf16 %v1089_v15  ;;  %v378_v37 = vadd.f32 %v376_v43, %v364_v26  ;;  %v379_v35 = vadd.f32 %v377_v24, %v365_v5  ;;  %v1419_v24 = vld [vmem:[#allocation6 + $0xe0] sm:$0xff]  ;;  %v1425_v5 = vld [vmem:[#allocation6 + $0xe8] sm:$0xff] }
  0x53   :  { %v405_v20 = vmul.f32 %v403_v3, %v1660_v9  ;;  %v685_v8 = vmul.f32 %v680_v6, %v1661_v17  ;;  %v427_v0 = vrot.slane %v1323_v48, %v1205_v7  ;;  %v431_v49 = vrot.slane %v1325_v2, %v1205_v7 }
  0x54   :  { %v686_v25 = vmul.f32 %v684_v38, %v1662_v19  ;;  %v673_v57 = vadd.f32 %v671_v47, %v659_v31  ;;  %v674_v12 = vadd.f32 %v672_v32, %v660_v30  ;;  %v694_v13 = vrot.slane %v1263_v29, %v1205_v7 }
  0x55   :  { %v698_v14 = vrot.slane %v1265_v63, %v1205_v7  ;;  %v392_v15 = vadd.f32 %v390_v11, %v378_v37  ;;  %v393_v6 = vadd.f32 %v391_v55, %v379_v35  ;;  %v1663_v38 = vunpack.c.l.bf16 %v1129_v40 }
  0x56   :  { %v1664_v48 = vunpack.c.h.bf16 %v1129_v40  ;;  %v687_v2 = vadd.f32 %v685_v8, %v673_v57  ;;  %v688_v47 = vadd.f32 %v686_v25, %v674_v12  ;;  %v1665_v32 = vunpack.c.l.bf16 %v1091_v16 }
  0x57   :  { %v418_v52 = vmul.f32 %v413_v42, %v1663_v38  ;;  %v1666_v43 = vunpack.c.h.bf16 %v1091_v16  ;;  %v406_v11 = vadd.f32 %v404_v23, %v392_v15  ;;  %v407_v55 = vadd.f32 %v405_v20, %v393_v6 }
  0x58   :  { %v419_v3 = vmul.f32 %v417_v10, %v1664_v48  ;;  %v699_v29 = vmul.f32 %v694_v13, %v1665_v32  ;;  %v1667_v50 = vunpack.c.l.bf16 %v1135_v45  ;;  %v1668_v26 = vunpack.c.h.bf16 %v1135_v45 }
  0x59   :  { %v700_v63 = vmul.f32 %v698_v14, %v1666_v43  ;;  %v118_v21 = vunpack.c.l.bf16 %v1407_v62  ;;  %v1632_v9 = vunpack.c.h.bf16 %v1407_v62  ;;  %v1631_v16 = vunpack.c.l.bf16 %v1413_v4 }
  0x5a   :  { %v432_v42 = vmul.f32 %v427_v0, %v1667_v50  ;;  %v433_v10 = vmul.f32 %v431_v49, %v1668_v26  ;;  %v701_v31 = vadd.f32 %v699_v29, %v687_v2  ;;  %v121_v17 = vunpack.c.h.bf16 %v1413_v4 }
  0x5b   :  { %v702_v30 = vadd.f32 %v700_v63, %v688_v47  ;;  %v420_v23 = vadd.f32 %v418_v52, %v406_v11  ;;  %v421_v20 = vadd.f32 %v419_v3, %v407_v55  ;;  %v122_v8 = vunpack.c.l.bf16 %v1419_v24 }
  0x5c   :  { %v123_v19 = vunpack.c.h.bf16 %v1419_v24  ;;  %v1433_v25 = vmax.f32 %v701_v31, 0.0  ;;  %v1630_v35 = vunpack.c.l.bf16 %v1425_v5  ;;  %v1629_v0 = vunpack.c.h.bf16 %v1425_v5 }
  0x5d   :  { %v1435_v37 = vmax.f32 %v702_v30, 0.0  ;;  %v434_v49 = vadd.f32 %v432_v42, %v420_v23  ;;  %v435_v57 = vadd.f32 %v433_v10, %v421_v20  ;;  %v1669_v3 = vunpack.c.l.bf16 %v1101_v22 }
  0x5e   :  { %v712_v12 = vrot.slane %v1433_v25, %v1186_v44  ;;  %v726_v14 = vrot.slane %v1433_v25, %v1192_v61  ;;  %v740_v52 = vrot.slane %v1433_v25, %v1195_v41  ;;  %v1670_v47 = vunpack.c.h.bf16 %v1101_v22 }
  0x5f   :  { %v716_v13 = vrot.slane %v1435_v37, %v1186_v44  ;;  %v730_v15 = vrot.slane %v1435_v37, %v1192_v61  ;;  %v436_v6 = vmax.f32 %v434_v49, 0.0  ;;  %v437_v38 = vmax.f32 %v435_v57, 0.0 }
  0x60   :  { %v744_v48 = vrot.slane %v1435_v37, %v1195_v41  ;;  %v717_v2 = vmul.f32 %v712_v12, %v1669_v3  ;;  %v1671_v29 = vunpack.c.l.bf16 %v1111_v27  ;;  %v1672_v63 = vunpack.c.h.bf16 %v1111_v27 }
  0x61   :  { %v718_v32 = vmul.f32 %v716_v13, %v1670_v47  ;;  %v445_v55 = vrot.slane %v436_v6, %v1186_v44  ;;  %v449_v50 = vrot.slane %v437_v38, %v1186_v44  ;;  %v459_v42 = vrot.slane %v436_v6, %v1192_v61 }
  0x62   :  { %v731_v43 = vmul.f32 %v726_v14, %v1671_v29  ;;  %v732_v11 = vmul.f32 %v730_v15, %v1672_v63  ;;  %v463_v26 = vrot.slane %v437_v38, %v1192_v61  ;;  %v473_v10 = vrot.slane %v436_v6, %v1195_v41 }
  0x63   :  { %v477_v31 = vrot.slane %v437_v38, %v1195_v41  ;;  %v487_v22 = vrot.slane %v436_v6, %v1197_v58  ;;  %v491_v30 = vrot.slane %v437_v38, %v1197_v58  ;;  %v1673_v23 = vunpack.c.l.bf16 %v1153_v59 }
  0x64   :  { %v1674_v20 = vunpack.c.h.bf16 %v1153_v59  ;;  %v1675_v57 = vunpack.c.l.bf16 %v1155_v60  ;;  %v1676_v13 = vunpack.c.h.bf16 %v1155_v60  ;;  %v1677_v15 = vunpack.c.l.bf16 %v1161_v53 }
  0x65   :  { %v450_v27 = vmul.f32 %v445_v55, %v1673_v23  ;;  %v1678_v47 = vunpack.c.h.bf16 %v1161_v53  ;;  %v492_v63 = vmul.f32 %v487_v22, %v1628_v54  ;;  %v1679_v55 = vunpack.c.h.bf16 %v1291_v1 }
  0x66   :  { %v451_v49 = vmul.f32 %v449_v50, %v1674_v20  ;;  %v464_v12 = vmul.f32 %v459_v42, %v1675_v57  ;;  %v465_v14 = vmul.f32 %v463_v26, %v1676_v13  ;;  %v478_v3 = vmul.f32 %v473_v10, %v1677_v15 }
  0x67   :  { %v479_v29 = vmul.f32 %v477_v31, %v1678_v47  ;;  %v493_v23 = vmul.f32 %v491_v30, %v1679_v55  ;;  %v452_v50 = vadd.f32 %v450_v27, %v1630_v35  ;;  %v501_v26 = vrot.slane %v436_v6, %v1199_v51 }
  0x68   :  { %v453_v42 = vadd.f32 %v451_v49, %v1629_v0  ;;  %v505_v20 = vrot.slane %v437_v38, %v1199_v51  ;;  %v515_v10 = vrot.slane %v436_v6, %v1201_v56  ;;  %v519_v31 = vrot.slane %v437_v38, %v1201_v56 }
  0x69   :  { %v529_v57 = vrot.slane %v436_v6, %v1203_v36  ;;  %v533_v22 = vrot.slane %v437_v38, %v1203_v36  ;;  %v466_v13 = vadd.f32 %v464_v12, %v452_v50  ;;  %v1680_v15 = vunpack.c.l.bf16 %v1297_v18 }
  0x6a   :  { %v467_v30 = vadd.f32 %v465_v14, %v453_v42  ;;  %v1681_v47 = vunpack.c.h.bf16 %v1297_v18  ;;  %v520_v55 = vmul.f32 %v515_v10, %v118_v21  ;;  %v521_v54 = vmul.f32 %v519_v31, %v1632_v9 }
  0x6b   :  { %v506_v27 = vmul.f32 %v501_v26, %v1680_v15  ;;  %v534_v0 = vmul.f32 %v529_v57, %v1631_v16  ;;  %v535_v35 = vmul.f32 %v533_v22, %v121_v17  ;;  %v480_v12 = vadd.f32 %v478_v3, %v466_v13 }
  0x6c   :  { %v507_v49 = vmul.f32 %v505_v20, %v1681_v47  ;;  %v481_v14 = vadd.f32 %v479_v29, %v467_v30  ;;  %v543_v50 = vrot.slane %v436_v6, %v1205_v7  ;;  %v547_v42 = vrot.slane %v437_v38, %v1205_v7 }
  0x6d   :  { %v1682_v26 = vunpack.c.l.bf16 %v1137_v46  ;;  %v1683_v10 = vunpack.c.h.bf16 %v1137_v46  ;;  %v1684_v31 = vunpack.c.l.bf16 %v1113_v28  ;;  %v1685_v57 = vunpack.c.h.bf16 %v1113_v28 }
  0x6e   :  { %v494_v9 = vadd.f32 %v492_v63, %v480_v12  ;;  %v495_v22 = vadd.f32 %v493_v23, %v481_v14  ;;  %v548_v3 = vmul.f32 %v543_v50, %v122_v8  ;;  %v549_v6 = vmul.f32 %v547_v42, %v123_v19 }
  0x6f   :  { %v719_v20 = vadd.f32 %v717_v2, %v1682_v26  ;;  %v720_v15 = vadd.f32 %v718_v32, %v1683_v10  ;;  %v745_v47 = vmul.f32 %v740_v52, %v1684_v31  ;;  %v746_v16 = vmul.f32 %v744_v48, %v1685_v57 }
  0x70   :  { %v754_v46 = vrot.slane %v1433_v25, %v1197_v58  ;;  %v758_v2 = vrot.slane %v1435_v37, %v1197_v58  ;;  %v508_v52 = vadd.f32 %v506_v27, %v494_v9  ;;  %v509_v32 = vadd.f32 %v507_v49, %v495_v22 }
  0x71   :  { %v733_v38 = vadd.f32 %v731_v43, %v719_v20  ;;  %v734_v29 = vadd.f32 %v732_v11, %v720_v15  ;;  %v768_v28 = vrot.slane %v1433_v25, %v1199_v51  ;;  %v772_v48 = vrot.slane %v1435_v37, %v1199_v51 }
  0x72   :  { %v1686_v13 = vunpack.c.l.bf16 %v1119_v33  ;;  %v1687_v11 = vunpack.c.h.bf16 %v1119_v33  ;;  %v522_v12 = vadd.f32 %v520_v55, %v508_v52  ;;  %v523_v14 = vadd.f32 %v521_v54, %v509_v32 }
  0x73   :  { %v747_v63 = vadd.f32 %v745_v47, %v733_v38  ;;  %v748_v23 = vadd.f32 %v746_v16, %v734_v29  ;;  %v1688_v50 = vunpack.c.l.bf16 %v1121_v34  ;;  %v1689_v27 = vunpack.c.h.bf16 %v1121_v34 }
  0x74   :  { %v759_v43 = vmul.f32 %v754_v46, %v1686_v13  ;;  %v760_v30 = vmul.f32 %v758_v2, %v1687_v11  ;;  %v782_v20 = vrot.slane %v1433_v25, %v1201_v56  ;;  %v786_v16 = vrot.slane %v1435_v37, %v1201_v56 }
  0x75   :  { %v773_v9 = vmul.f32 %v768_v28, %v1688_v50  ;;  %v774_v49 = vmul.f32 %v772_v48, %v1689_v27  ;;  %v536_v10 = vadd.f32 %v534_v0, %v522_v12  ;;  %v537_v15 = vadd.f32 %v535_v35, %v523_v14 }
  0x76   :  { %v761_v42 = vadd.f32 %v759_v43, %v747_v63  ;;  %v762_v26 = vadd.f32 %v760_v30, %v748_v23  ;;  %v796_v33 = vrot.slane %v1433_v25, %v1203_v36  ;;  %v800_v54 = vrot.slane %v1435_v37, %v1203_v36 }
  0x77   :  { %v1690_v34 = vunpack.c.l.bf16 %v1127_v39  ;;  %v1691_v57 = vunpack.c.h.bf16 %v1127_v39  ;;  %v550_v38 = vadd.f32 %v548_v3, %v536_v10  ;;  %v551_v29 = vadd.f32 %v549_v6, %v537_v15 }
  0x78   :  { %v775_v55 = vadd.f32 %v773_v9, %v761_v42  ;;  %v776_v31 = vadd.f32 %v774_v49, %v762_v26  ;;  %v1692_v46 = vunpack.c.l.bf16 %v1129_v40  ;;  %v1693_v35 = vunpack.c.h.bf16 %v1129_v40 }
  0x79   :  { %v787_v47 = vmul.f32 %v782_v20, %v1690_v34  ;;  %v788_v22 = vmul.f32 %v786_v16, %v1691_v57  ;;  %v810_v28 = vrot.slane %v1433_v25, %v1205_v7  ;;  %v814_v48 = vrot.slane %v1435_v37, %v1205_v7 }
  0x7a   :  { %v801_v0 = vmul.f32 %v796_v33, %v1692_v46  ;;  %v802_v2 = vmul.f32 %v800_v54, %v1693_v35  ;;  %v960_v63 = vmul.f32 -1.442695, %v550_v38  ;;  %v961_v23 = vmul.f32 -1.442695, %v551_v29 }
  0x7b   :  { %v789_v52 = vadd.f32 %v787_v47, %v775_v55  ;;  %v790_v32 = vadd.f32 %v788_v22, %v776_v31  ;;  %v1694_v3 = vunpack.c.l.bf16 %v1135_v45  ;;  %v1695_v43 = vunpack.c.h.bf16 %v1135_v45 }
  0x7c   :  { %971 = vpow2.f32 %v960_v63  ;;  %v1696_v26 = vunpack.c.l.bf16 %v1153_v59  ;;  %v1697_v16 = vunpack.c.h.bf16 %v1153_v59  ;;  %v1699_v33 = vunpack.c.h.bf16 %v1155_v60 }
  0x7d   :  { %v803_v39 = vadd.f32 %v801_v0, %v789_v52  ;;  %v804_v13 = vadd.f32 %v802_v2, %v790_v32  ;;  %v815_v6 = vmul.f32 %v810_v28, %v1694_v3  ;;  %v816_v11 = vmul.f32 %v814_v48, %v1695_v43 }
  0x7e   :  { %973 = vpow2.f32 %v961_v23  ;;  %v1700_v54 = vunpack.c.l.bf16 %v1161_v53  ;;  %v1703_v47 = vunpack.c.h.bf16 %v1425_v5  ;;  %v1705_v32 = vunpack.c.h.bf16 %v1291_v1 }
  0x7f   :  { %v817_v40 = vadd.f32 %v815_v6, %v803_v39  ;;  %v818_v30 = vadd.f32 %v816_v11, %v804_v13  ;;  %v1706_v48 = vunpack.c.l.bf16 %v1297_v18 }
  0x81   :  { %v819_v12 = vmax.f32 %v817_v40, 0.0  ;;  %v820_v14 = vmax.f32 %v818_v30, 0.0 }
  0x83   :  { %v828_v25 = vrot.slane %v819_v12, %v1186_v44  ;;  %v832_v37 = vrot.slane %v820_v14, %v1186_v44  ;;  %v842_v50 = vrot.slane %v819_v12, %v1192_v61  ;;  %v846_v9 = vrot.slane %v820_v14, %v1192_v61 }
  0x84   :  { %v856_v27 = vrot.slane %v819_v12, %v1195_v41  ;;  %v860_v49 = vrot.slane %v820_v14, %v1195_v41  ;;  %v870_v45 = vrot.slane %v819_v12, %v1197_v58  ;;  %v874_v42 = vrot.slane %v820_v14, %v1197_v58 }
  0x85   :  { %v833_v20 = vmul.f32 %v828_v25, %v1696_v26  ;;  %v834_v10 = vmul.f32 %v832_v37, %v1697_v16  ;;  %v1698_v44 = vunpack.c.l.bf16 %v1155_v60  ;;  %v848_v61 = vmul.f32 %v846_v9, %v1699_v33 }
  0x86   :  { %v861_v55 = vmul.f32 %v856_v27, %v1700_v54  ;;  %v1701_v41 = vunpack.c.h.bf16 %v1161_v53  ;;  %v1702_v58 = vunpack.c.l.bf16 %v1425_v5  ;;  %v884_v59 = vrot.slane %v819_v12, %v1199_v51  ;;  %v972_v38 = vpop.eup %971 }
  0x87   :  { %v847_v15 = vmul.f32 %v842_v50, %v1698_v44  ;;  %v836_v57 = vadd.f32 %v834_v10, %v1703_v47  ;;  %v888_v22 = vrot.slane %v820_v14, %v1199_v51  ;;  %v1704_v60 = vunpack.c.l.bf16 %v1291_v1 }
  0x88   :  { %v862_v31 = vmul.f32 %v860_v49, %v1701_v41  ;;  %v835_v34 = vadd.f32 %v833_v20, %v1702_v58  ;;  %v898_v46 = vrot.slane %v819_v12, %v1201_v56  ;;  %v902_v0 = vrot.slane %v820_v14, %v1201_v56  ;;  %v974_v53 = vpop.eup %973 }
  0x89   :  { %v875_v29 = vmul.f32 %v870_v45, %v1704_v60  ;;  %v558_v35 = vadd.f32 1.0, %v972_v38  ;;  %v850_v52 = vadd.f32 %v848_v61, %v836_v57  ;;  %v876_v5 = vmul.f32 %v874_v42, %v1705_v32 }
  0x8a   :  { %v849_v2 = vadd.f32 %v847_v15, %v835_v34  ;;  %v559_v28 = vadd.f32 1.0, %v974_v53  ;;  %v889_v63 = vmul.f32 %v884_v59, %v1706_v48  ;;  %v912_v51 = vrot.slane %v819_v12, %v1203_v36 }
  0x8b   :  { %v916_v23 = vrot.slane %v820_v14, %v1203_v36  ;;  %975 = vrcp.f32 %v558_v35  ;;  %v864_v13 = vadd.f32 %v862_v31, %v850_v52  ;;  %v1707_v56 = vunpack.c.h.bf16 %v1297_v18 }
  0x8c   :  { %v863_v39 = vadd.f32 %v861_v55, %v849_v2  ;;  %977 = vrcp.f32 %v559_v28  ;;  %v903_v6 = vmul.f32 %v898_v46, %v118_v21  ;;  %v1708_v1 = vunpack.c.h.bf16 %v1407_v62 }
  0x8d   :  { %v890_v3 = vmul.f32 %v888_v22, %v1707_v56  ;;  %v878_v40 = vadd.f32 %v876_v5, %v864_v13  ;;  %v926_v30 = vrot.slane %v819_v12, %v1205_v7  ;;  %v930_v25 = vrot.slane %v820_v14, %v1205_v7 }
  0x8e   :  { %v904_v43 = vmul.f32 %v902_v0, %v1708_v1  ;;  %v877_v11 = vadd.f32 %v875_v29, %v863_v39  ;;  %v1709_v50 = vunpack.c.l.bf16 %v1413_v4  ;;  %v918_v18 = vmul.f32 %v916_v23, %v121_v17 }
  0x8f   :  { %v892_v37 = vadd.f32 %v890_v3, %v878_v40  ;;  %v931_v62 = vmul.f32 %v926_v30, %v122_v8  ;;  %v932_v21 = vmul.f32 %v930_v25, %v123_v19 }
  0x90   :  { %v891_v36 = vadd.f32 %v889_v63, %v877_v11  ;;  %v917_v9 = vmul.f32 %v912_v51, %v1709_v50 }
  0x91   :  { %v906_v49 = vadd.f32 %v904_v43, %v892_v37 }
  0x92   :  { %v905_v27 = vadd.f32 %v903_v6, %v891_v36 }
  0x93   :  { %v920_v12 = vadd.f32 %v918_v18, %v906_v49 }
  0x94   :  { %v919_v45 = vadd.f32 %v917_v9, %v905_v27 }
  0x95   :  { %v976_v42 = vpop.eup %975  ;;  %v934_v14 = vadd.f32 %v932_v21, %v920_v12 }
  0x96   :  { %v933_v7 = vadd.f32 %v931_v62, %v919_v45  ;;  %v978_v26 = vpop.eup %977 }
  0x97   :  { %v566_v20 = vcombine.low %v976_v42, %v978_v26  ;;  %v965_v10 = vmul.f32 -1.442695, %v934_v14 }
  0x98   :  { %v964_v16 = vmul.f32 -1.442695, %v933_v7 }
  0x99   :  { %568 = vst [vmem:[%s1619_s2] sm:$0x77] %v566_v20 }
  0x9a   :  { %979 = vpow2.f32 %v964_v16 }
  0x9b   :  { %981 = vpow2.f32 %v965_v10 }
  0xa4   :  { %v980_v4 = vpop.eup %979 }
  0xa5   :  { %v982_v17 = vpop.eup %981  ;;  %v941_v8 = vadd.f32 1.0, %v980_v4 }
  0xa6   :  { %v942_v24 = vadd.f32 1.0, %v982_v17 }
  0xa7   :  { %983 = vrcp.f32 %v941_v8 }
  0xa8   :  { %985 = vrcp.f32 %v942_v24 }
  0xb1   :  { %v984_v19 = vpop.eup %983 }
  0xb2   :  { %v986_v44 = vpop.eup %985 }
  0xb3   :  { %v949_v15 = vcombine.low %v984_v19, %v986_v44 }
  0xb5   :  { %966 = vst [vmem:[%s1619_s2 + $0x8] sm:$0x77] %v949_v15 }
  0xb6   :  { %957 = vsyncpa [#allocation4], 1 }
  0xb7   :  { %958 = vsyncpa [#allocation5], 1 }

</bundles_post_ra>
